<compile_context>
chip_gen: v5e
topology: v5e:2x2
jax: 0.10.0
libtpu: 0.0.40
codegen_flags: <defaults>
</compile_context>

<pallas_src>
import jax
import jax.numpy as jnp
from jax.experimental import pallas as pl
from jax.experimental.pallas import tpu as pltpu

_LANE = 128
_MIB = 1024 * 1024


def _add_one_kernel(x_ref, o_ref):
    # Hot path: single VPU elementwise add over the whole VMEM tile.
    o_ref[...] = x_ref[...] + jnp.asarray(1, dtype=x_ref.dtype)


def _round_up(n: int, m: int) -> int:
    return ((n + m - 1) // m) * m


def _sublane_multiple(dtype) -> int:
    # Sub-32-bit dtypes pack along sublanes: 8 for 4B, 16 for 2B, 32 for 1B.
    itemsize = jnp.dtype(dtype).itemsize
    return max(8, 32 // max(1, itemsize))


def _is_v7x() -> bool:
    try:
        return "v7" in jax.devices()[0].device_kind.lower()
    except Exception:
        return False


def _num_tensorcores() -> int:
    # v7x has 2 TensorCores per chip; v5e/v6e have 1. Grid splitting only helps
    # on multi-TC chips (grid is a serial loop on a single TC).
    return 2 if _is_v7x() else 1


def _tile_config():
    """(target_block_bytes, vmem_limit_bytes) per TPU generation."""
    if _is_v7x():
        # 64 MiB physical VMEM; 4 MiB tiles (4 live buffers = 16 MiB) amortize
        # the ~0.35us/grid-step cost against 3.2 TB/s HBM.
        return 4 * _MIB, 40 * _MIB
    # v5e/v6e: 128 MiB physical VMEM; 8 MiB tiles (32 MiB live double-buffered
    # in+out) run at/above the 2 MiB-tile roofline fraction with fewer steps.
    return 8 * _MIB, 48 * _MIB


def _add_one_2d(x2d: jax.Array, *, alias_input: bool = False) -> jax.Array:
    """Run the Pallas add-one kernel over a 2-D slab (rows, cols)."""
    rows, cols = x2d.shape
    dtype = x2d.dtype
    itemsize = jnp.dtype(dtype).itemsize
    sub = _sublane_multiple(dtype)
    target_block_bytes, vmem_limit = _tile_config()
    num_tc = _num_tensorcores()

    # Rows per block: as many full sublane groups as fit the byte target.
    target_rows = max(sub, (target_block_bytes // max(1, cols * itemsize)) // sub * sub)

    if rows <= target_rows:
        if num_tc > 1 and rows >= num_tc * sub:
            # Multi-TC (v7x) only: split so every TensorCore gets a block.
            block_rows = _round_up(pl.cdiv(rows, num_tc), sub)
        else:
            # Single block; a block dim equal to the full array dim is legal
            # even when it is not a multiple of the sublane count.
            block_rows = rows
    else:
        block_rows = target_rows  # multiple of sub; last block may be partial

    grid = (pl.cdiv(rows, block_rows),)  # partial last block masked by Pallas

    kwargs = {}
    if alias_input:
        # Only meaningful when the caller donates x; harmless (XLA copies) otherwise.
        kwargs["input_output_aliases"] = {0: 0}

    # TODO(synk): on v7x, confirm via xprof that dimension_semantics=("parallel",)
    # actually shards the 1-D grid across both TensorCores; if not, switch to
    # pltpu.CORE_PARALLEL / pl.core_map with an even number of equal blocks.
    return pl.pallas_call(
        _add_one_kernel,
        out_shape=jax.ShapeDtypeStruct((rows, cols), dtype),
        grid_spec=pltpu.PrefetchScalarGridSpec(
            num_scalar_prefetch=0,
            grid=grid,
            in_specs=[pl.BlockSpec((block_rows, cols), lambda i: (i, 0))],
            out_specs=pl.BlockSpec((block_rows, cols), lambda i: (i, 0)),
        ),
        compiler_params=pltpu.CompilerParams(
            dimension_semantics=("parallel",),
            vmem_limit_bytes=vmem_limit,
        ),
        cost_estimate=pl.CostEstimate(
            flops=rows * cols,
            transcendentals=0,
            bytes_accessed=2 * rows * cols * itemsize,
        ),
        **kwargs,
    )(x2d)


def test_net_forward(
    x: jax.Array,
    *,
    min_pallas_bytes: int = 256 * 1024,
    alias_input: bool = False,
) -> jax.Array:
    """Pallas equivalent of TestNet.forward: returns x + 1 (same shape/dtype)."""
    orig_shape = x.shape
    dtype = x.dtype
    itemsize = jnp.dtype(dtype).itemsize
    total = x.size
    total_bytes = total * itemsize

    # Tiny-input fast path: fixed pallas_call / grid-setup overhead (a few us)
    # dwarfs the work, so just let XLA do it.
    if total == 0 or total_bytes < min_pallas_bytes:
        return x + jnp.asarray(1, dtype=dtype)

    if total % _LANE == 0:
        # Lane-aligned total: present a lane-dense slab. Prefer wider rows (up
        # to 1024 lanes) so each output row is several unmasked full-width vst
        # bursts. A flat reshape of a contiguous array should be a bitcast.
        # TODO(synk): check HLO that this reshape never lowers to a relayout copy.
        cols = _LANE
        for cand in (1024, 512, 256):
            if total % cand == 0:
                cols = cand
                break
        x2d = x.reshape(total // cols, cols)
        out2d = _add_one_2d(x2d, alias_input=alias_input)
        return out2d.reshape(orig_shape)

    # Unaligned total: avoid the pad + slice round trip (each is a full extra
    # HBM pass). Collapse leading dims and keep the natural trailing dim as the
    # lane axis; a full-extent last block dim is legal even when it is not a
    # multiple of 128 (stores are masked, but no extra HBM traffic is created).
    cols = orig_shape[-1] if x.ndim >= 2 else total
    sub = _sublane_multiple(dtype)
    if cols * itemsize * sub > 16 * _MIB:
        # Pathological trailing dim: a single (sub, cols) tile would not fit
        # comfortably in VMEM; let XLA stream it (still at HBM roofline).
        return x + jnp.asarray(1, dtype=dtype)
    x2d = x.reshape(total // cols, cols)
    out2d = _add_one_2d(x2d, alias_input=alias_input)
    return out2d.reshape(orig_shape)


if __name__ == "__main__":
    key = jax.random.PRNGKey(0)
    # Small NCHW-shaped input consistent with a conv-style module.
    x = jax.random.normal(key, (2, 4, 16, 16), dtype=jnp.float32)
    expected = x + 1.0

    # Force the Pallas path even for this tiny test tensor.
    y = test_net_forward(x, min_pallas_bytes=0)
    jax.block_until_ready(y)
    assert y.shape == x.shape and y.dtype == x.dtype
    assert jnp.array_equal(y, expected)

    # Default path (tiny-input XLA fast path) must match too.
    y_fast = test_net_forward(x)
    jax.block_until_ready(y_fast)
    assert jnp.array_equal(y_fast, expected)

    # Non-lane-aligned total: exercises the collapse-leading-dims path
    # (no pad / slice round trip, full-extent 24-wide lane axis).
    x2 = jax.random.normal(jax.random.PRNGKey(0), (3, 5, 24, 24), dtype=jnp.float32)
    y2 = test_net_forward(x2, min_pallas_bytes=0)
    jax.block_until_ready(y2)
    assert y2.shape == x2.shape and y2.dtype == x2.dtype
    assert jnp.array_equal(y2, x2 + 1.0)

    # input_output_aliases path (becomes a true in-place update when the caller
    # donates x; here it is just verified to produce identical results).
    x3 = jax.random.normal(jax.random.PRNGKey(0), (16, 256), dtype=jnp.float32)
    expected3 = x3 + 1.0
    y3 = jax.jit(lambda a: test_net_forward(a, min_pallas_bytes=0, alias_input=True))(x3)
    jax.block_until_ready(y3)
    assert jnp.array_equal(y3, expected3)

    print("KERNEL_OK")
</pallas_src>

<mosaic_0001>
module attributes {stable_mosaic.version = 11 : i64} {
  func.func @_add_one_kernel(%arg0: i32, %arg1: memref<2x1024xf32, #tpu.memory_space<vmem>>, %arg2: memref<2x1024xf32, #tpu.memory_space<vmem>>) attributes {dimension_semantics = [#tpu.dimension_semantics<parallel>], iteration_bounds = array<i64: 1>, scalar_prefetch = 0 : i64, scratch_operands = 0 : i64, tpu.core_type = #tpu.core_type<tc>, window_params = [{transform_indices = @transform_0, window_bounds = array<i64: 2, 1024>}, {transform_indices = @transform_1, window_bounds = array<i64: 2, 1024>}]} {
    %c0 = arith.constant 0 : index
    %c0_0 = arith.constant 0 : index
    %0 = vector.load %arg1[%c0, %c0_0] : memref<2x1024xf32, #tpu.memory_space<vmem>>, vector<2x1024xf32>
    %cst = arith.constant 1.000000e+00 : f32
    %1 = vector.broadcast %cst : f32 to vector<2x1024xf32>
    %2 = arith.addf %0, %1 : vector<2x1024xf32>
    %c0_1 = arith.constant 0 : index
    %c0_2 = arith.constant 0 : index
    %3 = vector.load %arg2[%c0_1, %c0_2] : memref<2x1024xf32, #tpu.memory_space<vmem>>, vector<2x1024xf32>
    tpu.vector_store %arg2[%c0_1, %c0_2], %2 {strides = array<i32>} : memref<2x1024xf32, #tpu.memory_space<vmem>>, vector<2x1024xf32>,
    return
  }
  func.func @transform_0(%arg0: i32) -> (i32, i32) {
    %c0_i32 = arith.constant 0 : i32
    %c0_i32_0 = arith.constant 0 : i32
    return %arg0, %c0_i32 : i32, i32
  }
  func.func @transform_1(%arg0: i32) -> (i32, i32) {
    %c0_i32 = arith.constant 0 : i32
    %c0_i32_0 = arith.constant 0 : i32
    return %arg0, %c0_i32 : i32, i32
  }
}

</mosaic_0001>

<bundles_post_ra>
// kernel: tpu_custom_call.1
= control target key start
LH: loop header
LB: loop body
LE: loop exit
PB: predicated region body
PF: predicated region fallthrough
CT: control target
= control target key end

     0   :  { %6 = vsyncpa [#allocation3], 0  ;;  %s118_s0 = inlined_call_operand.hbm [shape: f32[2,1024], index: 0, kind: input, shape index: {}]   ;;  %s119_s1 = inlined_call_operand.hbm [shape: f32[2,1024], index: 1, kind: output, shape index: {}]  }
   0x1   :  { %7 = vsyncpa [#allocation4], 0  ;;  %s13_s8 = sshll.u32 %s118_s0, 4  ;;  %s100_s9 = smov [#allocation2]   ;;  %s14_s8 = int_to_ptr.hbm [resolvable:$true] %s13_s8 }
   0x2   :  { %s15_s10 = sshll.u32 %s100_s9, 4  ;;  %s16_s10 = int_to_ptr.vmem [resolvable:$true] %s15_s10 }
   0x3   :  { %18 = dma.hbm_to_vmem [thread:$0]  %s14_s8, 256, %s16_s10, [#allocation3]  }
   0x4   :  { %96 = dma.done.wait [#allocation3], 256  }
   0x5   :  { %97 = vsyncadd [#allocation3], 4294967040  ;;  %s101_s11 = smov [#allocation5]   ;;  %s36_s15 = sshll.u32 %s119_s1, 4  ;;  %v23_v0 = vld [vmem:[#allocation2] sm:$0xff]  ;;  %v24_v1 = vld [vmem:[#allocation2 + $0x8] sm:$0xff]  ;;  %s37_s15 = int_to_ptr.hbm [resolvable:$true] %s36_s15 }
   0x6   :  { %s34_s12 = sshll.u32 %s101_s11, 4  ;;  %v25_v2 = vadd.f32 1.0, %v23_v0  ;;  %v26_v3 = vadd.f32 1.0, %v24_v1  ;;  %s35_s12 = int_to_ptr.vmem [resolvable:$true] %s34_s12 }
   0x8   :  { %27 = vst [vmem:[#allocation5] sm:$0xff] %v25_v2 }
   0x9   :  { %28 = vst [vmem:[#allocation5 + $0x8] sm:$0xff] %v26_v3 }
   0xa   :  { %39 = dma.vmem_to_hbm [thread:$0]  %s35_s12, 256, %s37_s15, [#allocation4]  }
   0xb   :  { %98 = dma.done.wait [#allocation4], 256  }
   0xc   :  { %99 = vsyncadd [#allocation4], 4294967040 }
   0xd   :  { %44 = vsyncpa [#allocation3], 1 }
   0xe   :  { %45 = vsyncpa [#allocation4], 1 }

</bundles_post_ra>
